<compile_context>
chip_gen: v7x
topology: tpu7x:2x2x1
jax: 0.10.0
libtpu: 0.0.40
codegen_flags: <defaults>
</compile_context>

<pallas_src>
import functools

import jax
import jax.numpy as jnp
from jax.experimental import pallas as pl
from jax.experimental.pallas import tpu as pltpu


def _round_up(x, m):
    return (x + m - 1) // m * m


@functools.cache
def _buffered_single_ok():
    """True iff this JAX/Pallas supports pipeline_mode=pl.Buffered(1).

    Probed by compiling a tiny throwaway kernel so a probe failure can never
    mask a genuine failure (e.g. VMEM OOM) of the real kernel.
    """
    try:
        def k(a_ref, c_ref, o_ref):
            o_ref[...] = a_ref[...] + c_ref[...]

        fn = pl.pallas_call(
            k,
            out_shape=jax.ShapeDtypeStruct((8, 128), jnp.float32),
            grid_spec=pltpu.PrefetchScalarGridSpec(
                num_scalar_prefetch=0,
                grid=(1,),
                in_specs=[
                    pl.BlockSpec((8, 128), lambda i: (0, 0)),
                    pl.BlockSpec((8, 128), lambda i: (0, 0),
                                 pipeline_mode=pl.Buffered(1)),
                ],
                out_specs=pl.BlockSpec((8, 128), lambda i: (0, 0)),
            ),
        )
        z = jnp.zeros((8, 128), jnp.float32)
        jax.jit(fn).lower(z, z).compile()
        return True
    except Exception:
        return False


def _default_vmem_limit():
    """~70% of this chip's per-core VMEM, clamped to [32, 96] MiB."""
    try:
        cap = int(pltpu.get_tpu_info().vmem_capacity_bytes)
        limit = int(cap * 0.7)
    except Exception:
        limit = 48 * 1024 * 1024
    return max(32 * 1024 * 1024, min(limit, 96 * 1024 * 1024))


def _layernorm_project(x_ref, gamma_ref, beta_ref, w_ref, eps, inv_c,
                       store_dtype):
    """Shared body: one-pass f32 LayerNorm stats + MXU projection."""
    x = x_ref[...].astype(jnp.float32)          # (tm, C)

    # One-pass statistics: fewer XLU reductions, no `centered` f32 temporary.
    s = jnp.sum(x, axis=-1, keepdims=True)
    ss = jnp.sum(x * x, axis=-1, keepdims=True)
    mean = s * inv_c
    var = jnp.maximum(ss * inv_c - mean * mean, 0.0)
    inv_std = jax.lax.rsqrt(var + eps)

    norm_f32 = (x - mean) * inv_std * gamma_ref[...] + beta_ref[...]
    # Round once to the storage dtype; the MXU consumes the weight's native
    # dtype (bf16 fast path when the model runs bf16 - no per-step W cast).
    norm = norm_f32.astype(store_dtype)
    proj = jnp.dot(norm.astype(w_ref.dtype), w_ref[...],
                   preferred_element_type=jnp.float32)
    return norm, proj


def _proj_and_norm_kernel(x_ref, gamma_ref, beta_ref, w_ref, b_ref,
                          proj_ref, norm_ref, *, eps, inv_c):
    norm, proj = _layernorm_project(x_ref, gamma_ref, beta_ref, w_ref,
                                    eps, inv_c, norm_ref.dtype)
    norm_ref[...] = norm
    # TODO(synk): dropout is identity in eval mode; training-mode masking would
    # need pltpu.prng_seed + pltpu.prng_random_bits and is not emitted.
    proj_ref[...] = (proj + b_ref[...]).astype(proj_ref.dtype)


def _proj_only_kernel(x_ref, gamma_ref, beta_ref, w_ref, b_ref, proj_ref, *,
                      eps, inv_c):
    _, proj = _layernorm_project(x_ref, gamma_ref, beta_ref, w_ref,
                                 eps, inv_c, proj_ref.dtype)
    proj_ref[...] = (proj + b_ref[...]).astype(proj_ref.dtype)


def stereonet_feature_projection(hidden_states, gamma, beta, w_t, bias, *,
                                 eps=1e-5, row_tile=1024, return_norm=True,
                                 mxu_bf16=False, vmem_limit_bytes=None):
    """StereoNetFeatureProjection forward (eval mode).

    hidden_states: (B, S, C); gamma/beta: (C,) LayerNorm affine;
    w_t: (C, H) = Linear.weight.T; bias: (H,).
    Returns (projected (B,S,H), norm_hidden_states (B,S,C)).  The second output
    is None when return_norm=False (skips a full HBM write for callers that
    drop it).
    """
    B, S, C = hidden_states.shape
    Cw, H = w_t.shape
    assert Cw == C, "weight contraction dim must match conv_dim[-1]"
    rows = B * S
    out_dtype = hidden_states.dtype

    if vmem_limit_bytes is None:
        vmem_limit_bytes = _default_vmem_limit()

    # Big row tiles amortize the ~0.35us per-grid-step cost; clamp so the grid
    # always has >= 2 steps (uses both v7x TensorCores, keeps DMA/compute
    # overlap even for small inputs).  The partial last block is masked by
    # Pallas -- no wrapper-side padding or slicing, no extra HBM passes.
    sub = 8 if jnp.dtype(out_dtype).itemsize >= 4 else 16
    two_step_tile = _round_up(pl.cdiv(rows, 2), sub)
    row_tile = max(sub, min(int(row_tile), two_step_tile))
    row_tile = _round_up(row_tile, sub)
    grid = (pl.cdiv(rows, row_tile),)

    x2d = hidden_states.reshape(rows, C)

    # Small affine params hoisted to f32 once (no per-step casts in-kernel).
    gamma2d = gamma.astype(jnp.float32).reshape(1, C)
    beta2d = beta.astype(jnp.float32).reshape(1, C)
    bias2d = bias.astype(jnp.float32).reshape(1, H)
    # Projection weight stays in its native dtype for the MXU fast path; on
    # f32 models the caller may opt into bf16 MXU operands (f32 accumulate),
    # mainly useful on v7x where the f32-matmul roofline crossover is lower.
    w_mxu = (w_t.astype(jnp.bfloat16)
             if (mxu_bf16 and w_t.dtype == jnp.float32) else w_t)

    single_buffer = _buffered_single_ok()

    def const_spec(shape):
        # Constant index_map across the grid -> one VMEM copy is enough.
        if single_buffer:
            return pl.BlockSpec(shape, lambda i: (0, 0),
                                pipeline_mode=pl.Buffered(1))
        return pl.BlockSpec(shape, lambda i: (0, 0))

    in_specs = [
        pl.BlockSpec((row_tile, C), lambda i: (i, 0)),  # x rows tile
        const_spec((1, C)),     # gamma (f32)
        const_spec((1, C)),     # beta  (f32)
        const_spec((C, H)),     # W^T (native / bf16 dtype)
        const_spec((1, H)),     # bias (f32)
    ]
    proj_spec = pl.BlockSpec((row_tile, H), lambda i: (i, 0))
    norm_spec = pl.BlockSpec((row_tile, C), lambda i: (i, 0))

    itemsize = jnp.dtype(out_dtype).itemsize
    bytes_accessed = (rows * C * itemsize                        # read x
                      + C * H * jnp.dtype(w_mxu.dtype).itemsize  # read W
                      + rows * H * itemsize                      # write proj
                      + (rows * C * itemsize if return_norm else 0)
                      + 4 * (2 * C + H))                         # affine params
    cost = pl.CostEstimate(flops=2 * rows * C * H + 8 * rows * C,
                           transcendentals=rows,
                           bytes_accessed=int(bytes_accessed))

    compiler_params = pltpu.CompilerParams(
        dimension_semantics=("parallel",),
        vmem_limit_bytes=int(vmem_limit_bytes))

    if return_norm:
        fn = pl.pallas_call(
            functools.partial(_proj_and_norm_kernel, eps=float(eps),
                              inv_c=1.0 / C),
            out_shape=(jax.ShapeDtypeStruct((rows, H), out_dtype),   # projected
                       jax.ShapeDtypeStruct((rows, C), out_dtype)),  # norm
            grid_spec=pltpu.PrefetchScalarGridSpec(
                num_scalar_prefetch=0, grid=grid,
                in_specs=in_specs, out_specs=[proj_spec, norm_spec]),
            compiler_params=compiler_params,
            cost_estimate=cost)
        proj2d, norm2d = fn(x2d, gamma2d, beta2d, w_mxu, bias2d)
        return proj2d.reshape(B, S, H), norm2d.reshape(B, S, C)

    fn = pl.pallas_call(
        functools.partial(_proj_only_kernel, eps=float(eps), inv_c=1.0 / C),
        out_shape=jax.ShapeDtypeStruct((rows, H), out_dtype),
        grid_spec=pltpu.PrefetchScalarGridSpec(
            num_scalar_prefetch=0, grid=grid,
            in_specs=in_specs, out_specs=proj_spec),
        compiler_params=compiler_params,
        cost_estimate=cost)
    proj2d = fn(x2d, gamma2d, beta2d, w_mxu, bias2d)
    return proj2d.reshape(B, S, H), None


if __name__ == "__main__":
    eps = 1e-5

    def reference(x, gamma, beta, w, bias):
        xf = x.astype(jnp.float32)
        mu = jnp.mean(xf, axis=-1, keepdims=True)
        var = jnp.mean((xf - mu) ** 2, axis=-1, keepdims=True)
        norm = (xf - mu) * jax.lax.rsqrt(var + eps) * gamma + beta
        proj = norm @ w.T + bias
        return proj, norm

    key = jax.random.PRNGKey(0)
    k_x, k_g, k_b, k_w, k_bias = jax.random.split(key, 5)

    # Small config consistent with the module: conv_dim[-1]=32, hidden_size=64.
    B, S, C, H = 2, 8, 32, 64
    hidden_states = jax.random.normal(k_x, (B, S, C), dtype=jnp.float32)
    gamma = 1.0 + 0.01 * jax.random.normal(k_g, (C,), dtype=jnp.float32)
    beta = 0.01 * jax.random.normal(k_b, (C,), dtype=jnp.float32)
    # nn.Linear weight is (H, C); the kernel takes it transposed as (C, H).
    w = 0.05 * jax.random.normal(k_w, (H, C), dtype=jnp.float32)
    bias = 0.01 * jax.random.normal(k_bias, (H,), dtype=jnp.float32)

    proj, norm = stereonet_feature_projection(
        hidden_states, gamma, beta, w.T, bias, eps=eps)
    jax.block_until_ready((proj, norm))

    proj_ref, norm_ref = reference(hidden_states, gamma, beta, w, bias)
    assert proj.shape == (B, S, H) and norm.shape == (B, S, C)
    assert jnp.allclose(norm, norm_ref, atol=1e-4, rtol=1e-4)
    assert jnp.allclose(proj, proj_ref, atol=1e-4, rtol=1e-4)

    # Second shape where rows is NOT divisible by the row tile: exercises the
    # masked partial last grid block (no wrapper padding / slicing).
    B2, S2 = 2, 9
    x2 = jax.random.normal(k_x, (B2, S2, C), dtype=jnp.float32)
    proj2, norm2 = stereonet_feature_projection(
        x2, gamma, beta, w.T, bias, eps=eps)
    jax.block_until_ready((proj2, norm2))
    proj2_ref, norm2_ref = reference(x2, gamma, beta, w, bias)
    assert jnp.allclose(norm2, norm2_ref, atol=1e-4, rtol=1e-4)
    assert jnp.allclose(proj2, proj2_ref, atol=1e-4, rtol=1e-4)

    print("KERNEL_OK")
</pallas_src>

<mosaic_0001>
module attributes {stable_mosaic.version = 11 : i64} {
  func.func @_proj_and_norm_kernel(%arg0: i32, %arg1: memref<8x32xf32, #tpu.memory_space<vmem>>, %arg2: memref<1x32xf32, #tpu.memory_space<vmem>>, %arg3: memref<1x32xf32, #tpu.memory_space<vmem>>, %arg4: memref<32x64xf32, #tpu.memory_space<vmem>>, %arg5: memref<1x64xf32, #tpu.memory_space<vmem>>, %arg6: memref<8x64xf32, #tpu.memory_space<vmem>>, %arg7: memref<8x32xf32, #tpu.memory_space<vmem>>) attributes {dimension_semantics = [#tpu.dimension_semantics<parallel>], iteration_bounds = array<i64: 2>, scalar_prefetch = 0 : i64, scratch_operands = 0 : i64, tpu.core_type = #tpu.core_type<tc>, window_params = [{transform_indices = @transform_0, window_bounds = array<i64: 8, 32>}, {pipeline_mode = #tpu.pipeline_mode<synchronous>, transform_indices = @transform_1, window_bounds = array<i64: 1, 32>}, {pipeline_mode = #tpu.pipeline_mode<synchronous>, transform_indices = @transform_2, window_bounds = array<i64: 1, 32>}, {pipeline_mode = #tpu.pipeline_mode<synchronous>, transform_indices = @transform_3, window_bounds = array<i64: 32, 64>}, {pipeline_mode = #tpu.pipeline_mode<synchronous>, transform_indices = @transform_4, window_bounds = array<i64: 1, 64>}, {transform_indices = @transform_5, window_bounds = array<i64: 8, 64>}, {transform_indices = @transform_6, window_bounds = array<i64: 8, 32>}]} {
    %c0 = arith.constant 0 : index
    %c0_0 = arith.constant 0 : index
    %0 = vector.load %arg1[%c0, %c0_0] : memref<8x32xf32, #tpu.memory_space<vmem>>, vector<8x32xf32>
    %cst = arith.constant dense<0.000000e+00> : vector<8xf32>
    %1 = vector.multi_reduction <add>, %0, %cst [1] : vector<8x32xf32> to vector<8xf32>
    %2 = vector.shape_cast %1 : vector<8xf32> to vector<8x1xf32>
    %3 = arith.mulf %0, %0 : vector<8x32xf32>
    %cst_1 = arith.constant dense<0.000000e+00> : vector<8xf32>
    %4 = vector.multi_reduction <add>, %3, %cst_1 [1] : vector<8x32xf32> to vector<8xf32>
    %5 = vector.shape_cast %4 : vector<8xf32> to vector<8x1xf32>
    %cst_2 = arith.constant 3.125000e-02 : f32
    %6 = vector.broadcast %cst_2 : f32 to vector<8x1xf32>
    %7 = arith.mulf %2, %6 : vector<8x1xf32>
    %cst_3 = arith.constant 3.125000e-02 : f32
    %8 = vector.broadcast %cst_3 : f32 to vector<8x1xf32>
    %9 = arith.mulf %5, %8 : vector<8x1xf32>
    %10 = arith.mulf %7, %7 : vector<8x1xf32>
    %11 = arith.subf %9, %10 : vector<8x1xf32>
    %cst_4 = arith.constant 0.000000e+00 : f32
    %12 = vector.broadcast %cst_4 : f32 to vector<8x1xf32>
    %13 = arith.maximumf %11, %12 : vector<8x1xf32>
    %cst_5 = arith.constant 9.99999974E-6 : f32
    %14 = vector.broadcast %cst_5 : f32 to vector<8x1xf32>
    %15 = arith.addf %13, %14 : vector<8x1xf32>
    %16 = math.rsqrt %15 : vector<8x1xf32>
    %17 = vector.broadcast %7 : vector<8x1xf32> to vector<8x32xf32>
    %18 = arith.subf %0, %17 : vector<8x32xf32>
    %19 = vector.broadcast %16 : vector<8x1xf32> to vector<8x32xf32>
    %20 = arith.mulf %18, %19 : vector<8x32xf32>
    %c0_6 = arith.constant 0 : index
    %c0_7 = arith.constant 0 : index
    %21 = vector.load %arg2[%c0_6, %c0_7] : memref<1x32xf32, #tpu.memory_space<vmem>>, vector<1x32xf32>
    %22 = vector.broadcast %21 : vector<1x32xf32> to vector<8x32xf32>
    %23 = arith.mulf %20, %22 : vector<8x32xf32>
    %c0_8 = arith.constant 0 : index
    %c0_9 = arith.constant 0 : index
    %24 = vector.load %arg3[%c0_8, %c0_9] : memref<1x32xf32, #tpu.memory_space<vmem>>, vector<1x32xf32>
    %25 = vector.broadcast %24 : vector<1x32xf32> to vector<8x32xf32>
    %26 = arith.addf %23, %25 : vector<8x32xf32>
    %c0_10 = arith.constant 0 : index
    %c0_11 = arith.constant 0 : index
    %27 = vector.load %arg4[%c0_10, %c0_11] : memref<32x64xf32, #tpu.memory_space<vmem>>, vector<32x64xf32>
    %cst_12 = arith.constant dense<0.000000e+00> : vector<8x64xf32>
    %28 = tpu.matmul %26, %27, %cst_12 {dimension_numbers = #tpu.dot_dimension_numbers<[1], [0], [0], [1], [0, 0, 1, 1], [], []>} : vector<8x32xf32>, vector<32x64xf32>, vector<8x64xf32> -> vector<8x64xf32>
    %c0_13 = arith.constant 0 : index
    %c0_14 = arith.constant 0 : index
    %29 = vector.load %arg7[%c0_13, %c0_14] : memref<8x32xf32, #tpu.memory_space<vmem>>, vector<8x32xf32>
    tpu.vector_store %arg7[%c0_13, %c0_14], %26 {strides = array<i32>} : memref<8x32xf32, #tpu.memory_space<vmem>>, vector<8x32xf32>,
    %c0_15 = arith.constant 0 : index
    %c0_16 = arith.constant 0 : index
    %30 = vector.load %arg5[%c0_15, %c0_16] : memref<1x64xf32, #tpu.memory_space<vmem>>, vector<1x64xf32>
    %31 = vector.broadcast %30 : vector<1x64xf32> to vector<8x64xf32>
    %32 = arith.addf %28, %31 : vector<8x64xf32>
    %c0_17 = arith.constant 0 : index
    %c0_18 = arith.constant 0 : index
    %33 = vector.load %arg6[%c0_17, %c0_18] : memref<8x64xf32, #tpu.memory_space<vmem>>, vector<8x64xf32>
    tpu.vector_store %arg6[%c0_17, %c0_18], %32 {strides = array<i32>} : memref<8x64xf32, #tpu.memory_space<vmem>>, vector<8x64xf32>,
    return
  }
  func.func @transform_0(%arg0: i32) -> (i32, i32) {
    %c0_i32 = arith.constant 0 : i32
    %c0_i32_0 = arith.constant 0 : i32
    return %arg0, %c0_i32 : i32, i32
  }
  func.func @transform_1(%arg0: i32) -> (i32, i32) {
    %c0_i32 = arith.constant 0 : i32
    %c0_i32_0 = arith.constant 0 : i32
    %c0_i32_1 = arith.constant 0 : i32
    return %c0_i32, %c0_i32_0 : i32, i32
  }
  func.func @transform_2(%arg0: i32) -> (i32, i32) {
    %c0_i32 = arith.constant 0 : i32
    %c0_i32_0 = arith.constant 0 : i32
    %c0_i32_1 = arith.constant 0 : i32
    return %c0_i32, %c0_i32_0 : i32, i32
  }
  func.func @transform_3(%arg0: i32) -> (i32, i32) {
    %c0_i32 = arith.constant 0 : i32
    %c0_i32_0 = arith.constant 0 : i32
    %c0_i32_1 = arith.constant 0 : i32
    return %c0_i32, %c0_i32_0 : i32, i32
  }
  func.func @transform_4(%arg0: i32) -> (i32, i32) {
    %c0_i32 = arith.constant 0 : i32
    %c0_i32_0 = arith.constant 0 : i32
    %c0_i32_1 = arith.constant 0 : i32
    return %c0_i32, %c0_i32_0 : i32, i32
  }
  func.func @transform_5(%arg0: i32) -> (i32, i32) {
    %c0_i32 = arith.constant 0 : i32
    %c0_i32_0 = arith.constant 0 : i32
    return %arg0, %c0_i32 : i32, i32
  }
  func.func @transform_6(%arg0: i32) -> (i32, i32) {
    %c0_i32 = arith.constant 0 : i32
    %c0_i32_0 = arith.constant 0 : i32
    return %arg0, %c0_i32 : i32, i32
  }
}

</mosaic_0001>

<bundles_post_ra>
// kernel: tpu_custom_call.1
= control target key start
LH: loop header
LB: loop body
LE: loop exit
PB: predicated region body
PF: predicated region fallthrough
CT: control target
= control target key end

     0   :  { %12 = vsyncpa [#allocation3], 0  ;;  %s1117_s0 = inlined_call_operand.hbm [shape: f32[16,32], index: 0, kind: input, shape index: {}]   ;;  %s1118_s1 = inlined_call_operand.vmem [shape: f32[1,32], index: 1, kind: input, shape index: {}]   ;;  %s1119_s2 = inlined_call_operand.vmem [shape: f32[1,32], index: 2, kind: input, shape index: {}]   ;;  %s1120_s3 = inlined_call_operand.hbm [shape: f32[32,64], index: 3, kind: input, shape index: {}]   ;;  %s1121_s4 = inlined_call_operand.vmem [shape: f32[1,64], index: 4, kind: input, shape index: {}]   ;;  %s1122_s5 = inlined_call_operand.hbm [shape: f32[16,64], index: 5, kind: output, shape index: {0}]   ;;  %s1123_s6 = inlined_call_operand.hbm [shape: f32[16,32], index: 6, kind: output, shape index: {1}]  }
   0x1   :  { %14 = vsyncpa [#allocation3 + $0x1], 0 }
   0x2   :  { %15 = vsyncpa [#allocation6], 0 }
   0x3   :  { %16 = vsyncpa [#allocation4], 0 }
   0x4   :  { %18 = vsyncpa [#allocation4 + $0x1], 0 }
   0x5   :  { %19 = vsyncpa [#allocation9], 0 }
   0x6   :  { %21 = vsyncpa [#allocation9 + $0x1], 0  ;;  %s876_s21 = smov 0   ;;  %s878_s22 = smov 0  }
   0x7   :  { %s880_s23 = smov 0   ;;  %s882_s24 = smov 0  }
   0x8 LB: > { %s897_s25 = sadd.s32 4294967295, %s830_s24   ;;  %s558_s26 = sadd.s32 4294967294, %s830_s24   ;;  %s830_s24 = sphi %s882_s24, %s1143_s24   ;;  %s826_s23 = sphi %s880_s23, %s1142_s23   ;;  %s822_s22 = sphi %s878_s22, %s1141_s22   ;;  %s818_s21 = sphi %s876_s21, %s1140_s21  }
   0x9   : > { %p47_p0 = scmp.ne.s32.totalorder %s822_s22, %s818_s21  ;;  %p1124_p1 = scmp.eq.s32.totalorder %s897_s25, 0 }
   0xa   : > { %p161_p3 = scmp.eq.s32.totalorder %s558_s26, 1  ;;  %p559_p5 = scmp.ge.s32.totalorder %s830_s24, 1 }
   0xb   : > { %p906_p4 = por %p1124_p1, %p47_p0  ;;  %p194_p7 = scmp.lt.s32.totalorder %s830_s24, 3 }
   0xc   : > { %p911_p6 = por %p161_p3, %p47_p0  ;;  %s832_s30 = smov [#allocation5]  }
   0xd   : > { %s1127_s27 = scalar_select %p906_p4, 1, 0 }
   0xe   : > { %s1128_s28 = scalar_select %p911_p6, 1, 0 }
   0xf   : > { %p916_p8 = pnand %p559_p5, %p194_p7  ;;  %s212_s7 = sshll.u32 %s832_s30, 4  ;;  %s920_s7 = int_to_ptr.vmem [resolvable:$true] %s212_s7 }
  0x10   : > { %s932_s9 = sadd.s32 1, %s830_s24   ;;  %s34_s10 = sadd.s32 1, %s826_s23 }
  0x11   : > { %s1129_s29 = scalar_select %p916_p8, 1, 0 }
  0x12   : > { %p611_p9 = pneg %p916_p8  ;;  %s31_s11 = ssub.s32 %s830_s24, %s932_s9 }
  0x13   : > { %s670_s14 = scalar_lea.hbm %s1120_s3, 512 }
  0x14   : > { %p927_p11 = pnand %p611_p9, %p1124_p1  ;;  %p671_p12 = scmp.ne.s32.totalorder %s1120_s3, %s670_s14 }
  0x15   : > { %p677_p5 = scmp.lt.u32.totalorder %s670_s14, %s1120_s3 }
  0x16   : > { %p672_p13 = pneg %p927_p11 }
  0x18   : > { %p673_p0 = pnand %p672_p13, %p671_p12 }
  0x1a   : > { %p674_p3 = pneg %p673_p0 }
  0x1c   : > { %p679_p7 = pnand %p677_p5, %p674_p3 }
  0x1e   : > { %682 = shalt.err (!%p679_p7)
}
  0x1f   : > { %s683_s19 = scalar_lea.vmem %s920_s7, 512  ;;  %p691_p2 = scmp.lt.s32.totalorder %s920_s7, %s920_s7 }
  0x20   : > { %p684_p9 = scmp.ne.s32.totalorder %s920_s7, %s683_s19  ;;  %p692_p6 = scmp.lt.s32.totalorder %s683_s19, %s683_s19 }
  0x22   : > { %p686_p10 = pnand %p684_p9, %p672_p13  ;;  %p693_p4 = por %p692_p6, %p691_p2 }
  0x24   : > { %p687_p1 = pneg %p686_p10 }
  0x26   : > { %p694_p8 = pnand %p693_p4, %p687_p1 }
  0x28   : > { %697 = shalt.err (!%p694_p8)
}
  0x29   : > { %s833_s20 = smov 128   ;;  %s834_s26 = smov 8  }
  0x2a   : > { %614 = dma.hbm_to_vmem [thread:$0]  (!%p927_p11), %s1120_s3, 512, %s920_s7, [#allocation6], %s833_s20, %s833_s20, %s834_s26  }
  0x2b   : > { %p32_p2 = scmp.eq.s32.totalorder %s31_s11, 0  ;;  %p41_p1 = scmp.ne.s32.totalorder %s826_s23, %s822_s22 }
  0x2c   : > { %p42_p4 = scmp.eq.s32.totalorder %s830_s24, 0  ;;  %p627_p6 = scmp.lt.s32.totalorder %s830_s24, 2 }
  0x2d   : > { %s963_s13 = scalar_select %p32_p2, %s826_s23, %s34_s10  }
  0x2e   : > { %p43_p8 = por %p42_p4, %p41_p1  ;;  %p1131_p10 = scmp.eq.s32.totalorder %s897_s25, 1 }
  0x2f   : > { %s229_s15 = sand.u32 1, %s826_s23   ;;  %s563_s16 = sshll.u32 %s830_s24, 7 }
  0x30   : > { %p967_p12 = por %p1131_p10, %p41_p1  ;;  %s562_s17 = sshll.u32 %s229_s15, 3 }
  0x31   : > { %s976_s19 = scalar_lea.hbm %s1117_s0, %s563_s16  ;;  %s233_s7 = scalar_lea.vmem [#allocation2], %s562_s17 }
  0x32   : > { %s240_s10 = sshll.u32 %s233_s7, 4  ;;  %p978_p11 = pnand %p627_p6, %p43_p8  ;;  %s982_s10 = int_to_ptr.vmem [resolvable:$true] %s240_s10 }
  0x33   : > { %s230_s20 = scalar_lea.sflag [#allocation3], %s229_s15  ;;  %s698_s26 = scalar_lea.hbm %s976_s19, 128 }
  0x34   : > { %p699_p13 = scmp.ne.s32.totalorder %s976_s19, %s698_s26  ;;  %p700_p0 = pneg %p978_p11 }
  0x35   : > { %s703_s16 = scalar_lea.hbm %s1117_s0, 256  ;;  %p704_p7 = scmp.lt.u32.totalorder %s976_s19, %s1117_s0 }
  0x36   : > { %p701_p3 = pnand %p700_p0, %p699_p13  ;;  %p705_p9 = scmp.lt.u32.totalorder %s703_s16, %s698_s26 }
  0x37   : > { %p707_p1 = scmp.lt.u32.totalorder %s698_s26, %s976_s19 }
  0x38   : > { %p702_p5 = pneg %p701_p3  ;;  %p706_p2 = por %p705_p9, %p704_p7 }
  0x3a   : > { %p708_p4 = por %p707_p1, %p706_p2 }
  0x3c   : > { %p709_p6 = pnand %p708_p4, %p702_p5 }
  0x3e   : > { %712 = shalt.err (!%p709_p6)
}
  0x3f   : > { %s713_s15 = scalar_lea.vmem %s982_s10, 128  ;;  %s835_s18 = smov [#allocation2]  }
  0x40   : > { %p714_p8 = scmp.ne.s32.totalorder %s982_s10, %s713_s15  ;;  %s718_s7 = sshll.u32 %s835_s18, 4  ;;  %s719_s7 = int_to_ptr.vmem [resolvable:$false] %s718_s7 }
  0x41   : > { %s720_s30 = scalar_lea.vmem %s719_s7, 256  ;;  %p721_p3 = scmp.lt.s32.totalorder %s982_s10, %s719_s7 }
  0x42   : > { %p716_p10 = pnand %p714_p8, %p700_p0  ;;  %p722_p7 = scmp.lt.s32.totalorder %s720_s30, %s713_s15 }
  0x44   : > { %p717_p13 = pneg %p716_p10  ;;  %p723_p9 = por %p722_p7, %p721_p3 }
  0x46   : > { %p724_p2 = pnand %p723_p9, %p717_p13 }
  0x48   : > { %727 = shalt.err (!%p724_p2)
}
  0x49   : > { %618 = dma.hbm_to_vmem [thread:$0]  (!%p978_p11), %s976_s19, 128, %s982_s10, %s230_s20  }
  0x4a   : > { %p1134_p5 = scmp.ne.s32.totalorder %s1129_s29, 0 }
  0x4b   : > { %s1012_s26 = sand.u32 (!%p1134_p5), 1, %s822_s22   ;;  %p1135_p0 = scmp.ne.s32.totalorder (!%p1134_p5), %s1127_s27, 0 }
  0x4c   : > { %249 = sbr.rel (%p1134_p5) target bundleno = 488 (0x1e8), region = 40  ;;  %s1015_s12 = sshll.u32 (!%p1134_p5), %s1012_s26, 3 }
  0x4d   : > { %s252_s16 = scalar_lea.sflag (!%p1134_p5), [#allocation3], %s1012_s26  ;;  %s255_s17 = scalar_lea.vmem (!%p1134_p5), [#allocation2], %s1015_s12 }
  0x53   : > { %801 = dma.done.wait (%p1135_p0), %s252_s16, 128  }
  0x54   : > { %803 = vsyncadd (%p1135_p0), %s252_s16, 4294967168  ;;  %p1136_p11 = scmp.eq.s32.totalorder %s897_s25, 0 }
  0x56   : > { %805 = dma.done.wait (%p1136_p11), [#allocation6], 512   ;;  %p1137_p1 = pmov %p1136_p11 }
  0x57   : > { %vm294_vm0 = vcmask 261120   ;;  %v293_v0 = vld [vmem:[%s255_s17] sm:$0xff]  ;;  %v327_v4 = vld [vmem:[#allocation5] sm:$0xff]  ;;  %v328_v5 = vld [vmem:[#allocation5 + $0x8] sm:$0xff]  ;;  %v836_v7 = vmov 0.0|0.0   ;;  %vm837_vm1 = vmmov 0  }
  0x58   : > { %807 = vsyncadd (%p1137_p1), [#allocation6], 4294966784  ;;  %v295_v1 = vsel %vm294_vm0, %v293_v0, 0.0  ;;  %v298_v2 = vmul.f32 %v293_v0, %v293_v0  ;;  %v329_v6 = vld [vmem:[#allocation5 + $0x10] sm:$0xff]  ;;  %595 = vmatprep.subr.bf16.mxu0 %v836_v7  ;;  %v596_v8 = vpack.c.bf16 %v328_v5, %v327_v4  ;;  %v330_v9 = vld [vmem:[#allocation5 + $0x18] sm:$0xff]  ;;  %v838_v10 = vmov 0.0  }
  0x59   : > { %296 = vadd.xlane.f32.xlu0 %v295_v1  ;;  %592 = vmatprep.mubr.msk.f32.mxu0 %vm837_vm1, %v838_v10  ;;  %v599_v11 = vpack.c.bf16 %v330_v9, %v329_v6  ;;  %v569_v22 = vld [vmem:[%s1118_s1] ss:$0 sm:$0xff]  ;;  %s292_s11 = scalar_lea.vmem [#allocation8], %s1015_s12  ;;  %s575_s20 = sshll.u32 %s897_s25, 7 }
  0x5a   : > { %v299_v3 = vsel %vm294_vm0, %v298_v2, 0.0  ;;  %597 = vmatpush3.bf16.msra.mxu0 %v596_v8  ;;  %v570_v24 = vld [vmem:[%s1119_s2] ss:$0 sm:$0xff]  ;;  %s1044_s18 = scalar_lea.hbm %s1123_s6, %s575_s20  ;;  %s446_s7 = sshll.u32 %s292_s11, 4  ;;  %s447_s7 = int_to_ptr.vmem [resolvable:$true] %s446_s7 }
  0x5b   : > { %598 = vmatprep.subr.bf16.mxu0 %v836_v7  ;;  %s420_s30 = scalar_lea.sflag [#allocation9], %s1012_s26  ;;  %s728_s16 = scalar_lea.vmem %s447_s7, 128 }
  0x5c   : > { %p729_p4 = scmp.ne.s32.totalorder %s447_s7, %s728_s16  ;;  %s839_s17 = smov [#allocation8]  }
  0x5d   : > { %300 = vadd.xlane.f32.xlu0 %v299_v3  ;;  %s732_s27 = sshll.u32 %s839_s17, 4  ;;  %s733_s27 = int_to_ptr.vmem [resolvable:$false] %s732_s27 }
  0x5e   : > { %600 = vmatpush3.bf16.msra.mxu0 %v599_v11  ;;  %p730_p6 = pnand %p729_p4, %p967_p12  ;;  %s734_s29 = scalar_lea.vmem %s733_s27, 256 }
  0x5f   : > { %p735_p10 = scmp.lt.s32.totalorder %s447_s7, %s733_s27  ;;  %p736_p13 = scmp.lt.s32.totalorder %s734_s29, %s728_s16 }
  0x60   : > { %p731_p8 = pneg %p730_p6 }
  0x61   : > { %p737_p3 = por %p736_p13, %p735_p10 }
  0x63   : > { %p738_p7 = pnand %p737_p3, %p731_p8 }
  0xe6   : > { %v297_v12 = vpop.xlane.xlu0 %296 }
  0xe7   : > { %v302_v13 = vmul.f32 0.03125, %v297_v12 }
  0xe9   : > { %v304_v15 = vmul.f32 %v302_v13, %v302_v13  ;;  %v309_v20 = vsub.f32 %v293_v0, %v302_v13 }
  0xea   : > { %v301_v14 = vpop.xlane.xlu0 %300 }
  0xeb   : > { %v303_v16 = vmul.f32 0.03125, %v301_v14 }
  0xed   : > { %v305_v17 = vsub.f32 %v303_v16, %v304_v15 }
  0xef   : > { %v306_v18 = vmax.f32 %v305_v17, 0.0 }
  0xf1   : > { %v307_v19 = vadd.f32 1e-05, %v306_v18 }
  0xf3   : > { %668 = vrsqrt.f32 %v307_v19 }
  0xfd   : > { %v669_v21 = vpop.eup %668 }
  0xfe   : > { %v310_v23 = vmul.f32 %v669_v21, %v309_v20 }
 0x100   : > { %v318_v25 = vmul.f32 %v569_v22, %v310_v23 }
 0x102   : > { %v326_v26 = vadd.f32 %v570_v24, %v318_v25 }
 0x104   : > { %593 = vmatmul.mubr.msk.f32.vlgmr.msra.gmra.mrb[0].mxu0 %vm294_vm0, %v326_v26  ;;  %331 = vst.msk [vmem:[%s292_s11] sm:$0xff] %vm294_vm0, %v326_v26 }
 0x105   : > { %741 = shalt.err (!%p738_p7)
}
 0x106   : > { %s742_s19 = scalar_lea.hbm %s1044_s18, 128  ;;  %s746_s8 = scalar_lea.hbm %s1123_s6, 256 }
 0x107   : > { %p743_p9 = scmp.ne.s32.totalorder %s1044_s18, %s742_s19  ;;  %p747_p0 = scmp.lt.u32.totalorder %s1044_s18, %s1123_s6 }
 0x108   : > { %p748_p11 = scmp.lt.u32.totalorder %s746_s8, %s742_s19  ;;  %p750_p4 = scmp.lt.u32.totalorder %s742_s19, %s1044_s18 }
 0x109   : > { %p744_p2 = pnand %p743_p9, %p967_p12 }
 0x10a   : > { %p749_p1 = por %p748_p11, %p747_p0 }
 0x10b   : > { %p745_p5 = pneg %p744_p2 }
 0x10c   : > { %p751_p6 = por %p750_p4, %p749_p1 }
 0x10e   : > { %p752_p8 = pnand %p751_p6, %p745_p5 }
 0x110   : > { %755 = shalt.err (!%p752_p8)
}
 0x111   : > { %608 = dma.vmem_to_hbm [thread:$0]  (%p967_p12), %s447_s7, 128, %s1044_s18, %s420_s30   ;;  %v571_v27 = vld [vmem:[%s1121_s4] ss:$0 sm:$0xff]  ;;  %vm412_vm2 = vcmask 523264  }
 0x112   : > { %s285_s29 = scalar_lea.vmem [#allocation7], %s1015_s12  ;;  %s1073_s8 = scalar_lea.hbm %s1122_s5, %s575_s20 }
 0x113   : > { %s433_s10 = sshll.u32 %s285_s29, 4  ;;  %s415_s18 = scalar_lea.sflag [#allocation4], %s1012_s26  ;;  %s1075_s10 = int_to_ptr.vmem [resolvable:$true] %s433_s10 }
 0x114   : > { %s756_s7 = scalar_lea.vmem %s1075_s10, 128  ;;  %s840_s12 = smov [#allocation7]  }
 0x115   : > { %p757_p10 = scmp.ne.s32.totalorder %s1075_s10, %s756_s7  ;;  %s760_s30 = sshll.u32 %s840_s12, 4  ;;  %s761_s30 = int_to_ptr.vmem [resolvable:$false] %s760_s30 }
 0x116   : > { %s762_s25 = scalar_lea.vmem %s761_s30, 256  ;;  %p763_p7 = scmp.lt.s32.totalorder %s1075_s10, %s761_s30 }
 0x117   : > { %p758_p13 = pnand %p757_p10, %p967_p12  ;;  %p764_p9 = scmp.lt.s32.totalorder %s762_s25, %s756_s7 }
 0x119   : > { %p759_p3 = pneg %p758_p13  ;;  %p765_p2 = por %p764_p9, %p763_p7 }
 0x11b   : > { %p766_p5 = pnand %p765_p2, %p759_p3 }
 0x1d7   : > { %v408_v28 = vpop.f32.mrb[0].mxu0 }
 0x1d8   : > { %v409_v29 = vadd.f32 %v571_v27, %v408_v28  ;;  %v594_v30 = vpop.f32.mrb[1].mxu0 }
 0x1da   : > { %413 = vst.msk [vmem:[%s285_s29] sm:$0xff] %vm412_vm2, %v409_v29 }
 0x1db   : > { %769 = shalt.err (!%p766_p5)
}
 0x1dc   : > { %s770_s26 = scalar_lea.hbm %s1073_s8, 128  ;;  %s774_s17 = scalar_lea.hbm %s1122_s5, 256 }
 0x1dd   : > { %p771_p0 = scmp.ne.s32.totalorder %s1073_s8, %s770_s26  ;;  %p775_p4 = scmp.lt.u32.totalorder %s1073_s8, %s1122_s5 }
 0x1de   : > { %p776_p6 = scmp.lt.u32.totalorder %s774_s17, %s770_s26  ;;  %p778_p10 = scmp.lt.u32.totalorder %s770_s26, %s1073_s8 }
 0x1df   : > { %p772_p11 = pnand %p771_p0, %p967_p12 }
 0x1e0   : > { %p777_p8 = por %p776_p6, %p775_p4 }
 0x1e1   : > { %p773_p1 = pneg %p772_p11 }
 0x1e2   : > { %p779_p13 = por %p778_p10, %p777_p8 }
 0x1e4   : > { %p780_p3 = pnand %p779_p13, %p773_p1 }
 0x1e6   : > { %783 = shalt.err (!%p780_p3)
}
 0x1e7   : > { %607 = dma.vmem_to_hbm [thread:$0]  (%p967_p12), %s1075_s10, 128, %s1073_s8, %s415_s18  }
 0x1e8 PF: > { %s458_s29 = sand.u32 1, %s818_s21   ;;  %p1138_p7 = scmp.ne.s32.totalorder %s1128_s28, 0 }
 0x1e9   : > { %p1139_p9 = scmp.ge.s32.totalorder %s830_s24, 2  ;;  %s459_s19 = scalar_lea.sflag [#allocation4], %s458_s29 }
 0x1eb   : > { %p620_p2 = pnand %p1139_p9, %p1138_p7 }
 0x1ed   : > { %809 = dma.done.wait (!%p620_p2), %s459_s19, 128  }
 0x1ee   : > { %811 = vsyncadd (!%p620_p2), %s459_s19, 4294967168  ;;  %s468_s11 = scalar_lea.sflag [#allocation9], %s458_s29 }
 0x1ef   : > { %813 = dma.done.wait (!%p620_p2), %s468_s11, 128  }
 0x1f0   : > { %815 = vsyncadd (!%p620_p2), %s468_s11, 4294967168  ;;  %p24_p12 = scmp.ge.s32.totalorder %s932_s9, 4   ;;  %s1140_s21 = smov %s822_s22 }
 0x1f1   : > { %s1141_s22 = smov %s826_s23  ;;  %s1142_s23 = smov %s963_s13 }
 0x1f2   : > { %s1143_s24 = smov %s932_s9  ;;  %26 = sbr.rel (!%p24_p12) target bundleno = 8 (0x8), region = 106 }
 0x1f9   :  { %473 = vsyncpa [#allocation3], 1 }
 0x1fa   :  { %475 = vsyncpa [#allocation3 + $0x1], 1 }
 0x1fb   :  { %476 = vsyncpa [#allocation6], 1 }
 0x1fc   :  { %477 = vsyncpa [#allocation4], 1 }
 0x1fd   :  { %479 = vsyncpa [#allocation4 + $0x1], 1 }
 0x1fe   :  { %480 = vsyncpa [#allocation9], 1 }
 0x1ff   :  { %482 = vsyncpa [#allocation9 + $0x1], 1 }

</bundles_post_ra>
